<compile_context>
chip_gen: v7x
topology: tpu7x:2x2x1
jax: 0.10.0
libtpu: 0.0.40
codegen_flags: <defaults>
</compile_context>

<pallas_src>
import jax
import jax.numpy as jnp
from jax.experimental import pallas as pl
from jax.experimental.pallas import tpu as pltpu

_LANES = 128
_SUBLANES = 8


def _round_up(x, m):
    return ((x + m - 1) // m) * m


def _pick_tile_rows(n_classes, rows):
    """Rows (of 128 pixels each) per grid step.

    Targets ~2 MiB of f32 logits per input block (measured BlockSpec scaling puts
    1-2 MiB blocks at ~85%+ of HBM roofline), multiple of 32 rows so f32/bf16/int8
    blocks all satisfy native tiling, capped near the actual row extent."""
    budget_bytes = 2 * 1024 * 1024
    tr = budget_bytes // (n_classes * _LANES * 4)
    tr = max(32, (tr // 32) * 32)
    cap = _round_up(rows, 32)
    return max(32, min(tr, cap, 4096))


def _make_loss_kernel(n_classes, tile_rows, rows_total, tiles_per_split, needs_mask):
    groups = tile_rows // _SUBLANES

    def kernel(logits_ref, tgt_ref, tp_ref, sp_ref, cnt_ref, ce_ref):
        s = pl.program_id(0)   # core split
        b = pl.program_id(1)   # batch (folded into the reduction)
        i = pl.program_id(2)   # pixel tile within this split

        # Zero the resident accumulator slab at the first step of each split's sweep.
        @pl.when(jnp.logical_and(b == 0, i == 0))
        def _():
            tp_ref[...] = jnp.zeros_like(tp_ref)
            sp_ref[...] = jnp.zeros_like(sp_ref)
            cnt_ref[...] = jnp.zeros_like(cnt_ref)
            ce_ref[...] = jnp.zeros_like(ce_ref)

        logits = logits_ref[...].astype(jnp.float32)   # (C, TR, 128)
        tgt = tgt_ref[...].astype(jnp.int32)           # (TR, 128)

        if needs_mask:
            # Mask garbage rows of ragged/partial blocks and wrapper-padded pixels
            # (padded targets are -1).  jnp.where is a select, so garbage NaN/inf
            # in the unselected operand cannot propagate.
            t_global = s * tiles_per_split + i
            row_ids = (t_global * tile_rows
                       + jax.lax.broadcasted_iota(jnp.int32, (tile_rows, _LANES), 0))
            valid = jnp.logical_and(row_ids < rows_total, tgt >= 0)
            logits = jnp.where(valid[None, :, :], logits, 0.0)
            tgt = jnp.where(valid, tgt, -1)

        # Softmax over the class axis.  Class is a leading (non-vreg) dim, so all of
        # this is dense elementwise VALU/EUP work across C slabs of (TR, 128).
        m = jnp.max(logits, axis=0)                              # (TR, 128)
        e = jnp.exp(logits - m[None, :, :])                      # (C, TR, 128)
        ssum = jnp.sum(e, axis=0)                                # (TR, 128)
        p = e * pl.reciprocal(ssum, approx=False)[None, :, :]    # exact softmax probs

        cls_ids = jax.lax.broadcasted_iota(
            jnp.int32, (n_classes, tile_rows, _LANES), 0)
        onehot = (cls_ids == tgt[None, :, :]).astype(jnp.float32)   # (C, TR, 128)

        tp_c = p * onehot                                        # (C, TR, 128)
        cnt_c = onehot
        sp_c = jnp.where(valid[None, :, :], p, 0.0) if needs_mask else p

        # Cross entropy: logsumexp(logits) - logit[target], per pixel (exact path).
        lse = jnp.log(ssum) + m                                  # (TR, 128)
        tgt_logit = jnp.sum(logits * onehot, axis=0)             # (TR, 128)
        ce_c = lse - tgt_logit
        if needs_mask:
            ce_c = jnp.where(valid, ce_c, 0.0)

        # Fold each step's contribution down to fixed (C, 8, 128) / (8, 128) slabs:
        # the reshape splits whole (8,128) vreg tiles, the sum over the group axis is
        # a leading-dim elementwise add, and the accumulator writeback stays tiny.
        tp_ref[...] += tp_c.reshape(n_classes, groups, _SUBLANES, _LANES).sum(axis=1)
        sp_ref[...] += sp_c.reshape(n_classes, groups, _SUBLANES, _LANES).sum(axis=1)
        cnt_ref[...] += cnt_c.reshape(n_classes, groups, _SUBLANES, _LANES).sum(axis=1)
        ce_ref[...] += ce_c.reshape(groups, _SUBLANES, _LANES).sum(axis=0)

    return kernel


def _dc_ce_stats(logits_4d, tgt_3d, col_padded):
    """logits_4d: (B, C, R, 128) float; tgt_3d: (B, R, 128) int8.

    Returns per-split accumulator slabs:
      tp, sum_p, cnt : (S, C, 8, 128) f32
      ce             : (S, 8, 128)    f32
    """
    B, C, R, L = logits_4d.shape
    assert L == _LANES

    tr = _pick_tile_rows(C, R)
    n_tiles = -(-R // tr)
    nsplit = 2 if n_tiles >= 2 else 1          # keep both v7x TensorCores busy
    tps = -(-n_tiles // nsplit)                # tiles per split
    needs_mask = (nsplit * tps * tr != R) or bool(col_padded)
    last_tile = n_tiles - 1

    kernel = _make_loss_kernel(C, tr, R, tps, needs_mask)

    def logits_idx(s, b, i):
        return (b, 0, jnp.minimum(s * tps + i, last_tile), 0)

    def tgt_idx(s, b, i):
        return (b, jnp.minimum(s * tps + i, last_tile), 0)

    def acc_idx4(s, b, i):
        return (s, 0, 0, 0)

    def acc_idx3(s, b, i):
        return (s, 0, 0)

    out_shape = (
        jax.ShapeDtypeStruct((nsplit, C, _SUBLANES, _LANES), jnp.float32),  # tp
        jax.ShapeDtypeStruct((nsplit, C, _SUBLANES, _LANES), jnp.float32),  # sum_p
        jax.ShapeDtypeStruct((nsplit, C, _SUBLANES, _LANES), jnp.float32),  # count
        jax.ShapeDtypeStruct((nsplit, _SUBLANES, _LANES), jnp.float32),     # ce
    )
    in_specs = [
        pl.BlockSpec((None, C, tr, _LANES), logits_idx),
        pl.BlockSpec((None, tr, _LANES), tgt_idx),
    ]
    out_specs = [
        pl.BlockSpec((None, C, _SUBLANES, _LANES), acc_idx4),
        pl.BlockSpec((None, C, _SUBLANES, _LANES), acc_idx4),
        pl.BlockSpec((None, C, _SUBLANES, _LANES), acc_idx4),
        pl.BlockSpec((None, _SUBLANES, _LANES), acc_idx3),
    ]

    n_pix = B * R * _LANES
    cost = pl.CostEstimate(
        flops=int(14 * C * n_pix),
        transcendentals=int((C + 1) * n_pix),
        bytes_accessed=int(n_pix * (4 * C + 1)),
    )

    return pl.pallas_call(
        kernel,
        out_shape=out_shape,
        grid_spec=pltpu.PrefetchScalarGridSpec(
            num_scalar_prefetch=0,
            grid=(nsplit, B, tps),
            in_specs=in_specs,
            out_specs=out_specs,
        ),
        compiler_params=pltpu.CompilerParams(
            # split axis parallel (megacore); batch & pixel-tiles are the reduction.
            dimension_semantics=("parallel", "arbitrary", "arbitrary"),
            # Big f32 temporaries need more than v5e's 16 MiB scoped default; 48 MiB
            # still leaves headroom on v7x's 64 MiB physical VMEM.
            vmem_limit_bytes=48 * 1024 * 1024,
        ),
        cost_estimate=cost,
    )(logits_4d, tgt_3d)


class CustomLoss:
    """JAX/Pallas equivalent of Training/Task_201_.../loss.py::CustomLoss.

    DC_and_CE_loss({'batch_dice': True, 'smooth': 1e-05, 'do_bg': False}, {})
    applied to the first deep-supervision output/target pair.
    ds_loss_weights is stored but (as in the reference forward) not applied.
    """

    def __init__(self, ds_loss_weights=None):
        self.ds_loss_weights = ds_loss_weights
        self.smooth = 1e-5

    def __call__(self, net_output, target):
        x = net_output[0]          # (B, C, *spatial) logits (f32 or bf16 passthrough)
        y = target[0]              # (B, 1, *spatial) class indices
        B, C = x.shape[0], x.shape[1]
        HW = 1
        for d in x.shape[2:]:
            HW *= d
        N = B * HW

        # Free reshapes only (no HBM transpose); keep logits dtype as-is.
        logits = x.reshape(B, C, HW)
        # TODO(synk): int8 targets assume < 128 classes (true for this task).
        tgt = y.reshape(B, HW).astype(jnp.int8)

        # Pad pixels to a multiple of 128 lanes only when needed (padded targets = -1
        # so the kernel masks them out of every statistic).
        pad = (-HW) % _LANES
        if pad:
            logits = jnp.pad(logits, ((0, 0), (0, 0), (0, pad)))
            tgt = jnp.pad(tgt, ((0, 0), (0, pad)), constant_values=-1)
        R = (HW + pad) // _LANES

        logits_4d = logits.reshape(B, C, R, _LANES)
        tgt_3d = tgt.reshape(B, R, _LANES)

        tp_o, sp_o, cnt_o, ce_o = _dc_ce_stats(logits_4d, tgt_3d, col_padded=bool(pad))

        # Tiny final reduction of the fixed-width accumulator slabs.
        tp = jnp.sum(tp_o, axis=(0, 2, 3))          # (C,)
        sum_p = jnp.sum(sp_o, axis=(0, 2, 3))       # (C,)
        cnt = jnp.sum(cnt_o, axis=(0, 2, 3))        # (C,)
        ce_sum = jnp.sum(ce_o)                      # scalar
        fp = sum_p - tp
        fn = cnt - tp

        # Soft dice (batch_dice=True, do_bg=False): drop class 0, mean, negate.
        nominator = 2.0 * tp + self.smooth
        denominator = 2.0 * tp + fp + fn + self.smooth
        dc = nominator / (denominator + 1e-8)
        dc_loss = -jnp.mean(dc[1:])

        # Cross entropy with default 'mean' reduction over all (unpadded) pixels.
        ce_loss = ce_sum / N

        return ce_loss + dc_loss


def _reference_loss(x, y):
    """Pure-JAX reference mirroring nnU-Net's DC_and_CE_loss semantics."""
    B, C = x.shape[:2]
    xf = x.astype(jnp.float32).reshape(B, C, -1)            # (B, C, HW)
    y_idx = y.reshape(B, -1).astype(jnp.int32)               # (B, HW)
    p = jax.nn.softmax(xf, axis=1)
    onehot = jax.nn.one_hot(y_idx, C, dtype=jnp.float32)     # (B, HW, C)
    onehot = jnp.transpose(onehot, (0, 2, 1))                # (B, C, HW)
    axes = (0, 2)
    tp = jnp.sum(p * onehot, axis=axes)
    fp = jnp.sum(p * (1.0 - onehot), axis=axes)
    fn = jnp.sum((1.0 - p) * onehot, axis=axes)
    smooth = 1e-5
    dc = (2.0 * tp + smooth) / (2.0 * tp + fp + fn + smooth + 1e-8)
    dc_loss = -jnp.mean(dc[1:])
    logp = jax.nn.log_softmax(xf, axis=1)
    ce_loss = -jnp.mean(jnp.sum(logp * onehot, axis=1))
    return ce_loss + dc_loss


if __name__ == "__main__":
    key = jax.random.PRNGKey(0)
    k1, k2, k3, k4 = jax.random.split(key, 4)

    loss_fn = CustomLoss(ds_loss_weights=[1.0])

    # Case 1: small NCHW (exercises the ragged / masked path: HW=256 -> 2 rows of 128).
    B, C, H, W = 2, 4, 16, 16
    logits = jax.random.normal(k1, (B, C, H, W), dtype=jnp.float32)
    labels = jax.random.randint(k2, (B, 1, H, W), 0, C, dtype=jnp.int32)
    loss = jax.block_until_ready(loss_fn([logits], [labels]))
    ref = jax.block_until_ready(_reference_loss(logits, labels))
    assert jnp.allclose(loss, ref, rtol=1e-5, atol=1e-5), (loss, ref)

    # Case 2: shape hitting the mask-free fast path (HW = 64*64 = 32 full row-tiles).
    B2, C2, H2, W2 = 1, 3, 64, 64
    logits2 = jax.random.normal(k3, (B2, C2, H2, W2), dtype=jnp.float32)
    labels2 = jax.random.randint(k4, (B2, 1, H2, W2), 0, C2, dtype=jnp.int32)
    loss2 = jax.block_until_ready(loss_fn([logits2], [labels2]))
    ref2 = jax.block_until_ready(_reference_loss(logits2, labels2))
    assert jnp.allclose(loss2, ref2, rtol=1e-5, atol=1e-5), (loss2, ref2)

    print("KERNEL_OK")
</pallas_src>

<mosaic_0001>
module attributes {stable_mosaic.version = 11 : i64} {
  func.func @kernel(%arg0: i32, %arg1: i32, %arg2: i32, %arg3: memref<1x4x32x128xf32, #tpu.memory_space<vmem>>, %arg4: memref<1x32x128xi8, #tpu.memory_space<vmem>>, %arg5: memref<1x4x8x128xf32, #tpu.memory_space<vmem>>, %arg6: memref<1x4x8x128xf32, #tpu.memory_space<vmem>>, %arg7: memref<1x4x8x128xf32, #tpu.memory_space<vmem>>, %arg8: memref<1x8x128xf32, #tpu.memory_space<vmem>>) attributes {dimension_semantics = [#tpu.dimension_semantics<parallel>, #tpu.dimension_semantics<arbitrary>, #tpu.dimension_semantics<arbitrary>], iteration_bounds = array<i64: 1, 2, 1>, scalar_prefetch = 0 : i64, scratch_operands = 0 : i64, tpu.core_type = #tpu.core_type<tc>, window_params = [{transform_indices = @transform_0, window_bounds = array<i64: 1, 4, 32, 128>}, {transform_indices = @transform_1, window_bounds = array<i64: 1, 32, 128>}, {transform_indices = @transform_2, window_bounds = array<i64: 1, 4, 8, 128>}, {transform_indices = @transform_3, window_bounds = array<i64: 1, 4, 8, 128>}, {transform_indices = @transform_4, window_bounds = array<i64: 1, 4, 8, 128>}, {transform_indices = @transform_5, window_bounds = array<i64: 1, 8, 128>}]} {
    %c0_i32 = arith.constant 0 : i32
    %0 = arith.cmpi eq, %arg1, %c0_i32 : i32
    %c0_i32_0 = arith.constant 0 : i32
    %1 = arith.cmpi eq, %arg2, %c0_i32_0 : i32
    %2 = arith.andi %0, %1 : i1
    %3 = arith.extui %2 : i1 to i32
    %c0_i32_1 = arith.constant 0 : i32
    %4 = arith.cmpi ne, %3, %c0_i32_1 : i32
    scf.if %4 {
      %cst_48 = arith.constant 0.000000e+00 : f32
      %89 = vector.broadcast %cst_48 : f32 to vector<4x8x128xf32>
      %c0_49 = arith.constant 0 : index
      %c0_50 = arith.constant 0 : index
      %c0_51 = arith.constant 0 : index
      %c0_52 = arith.constant 0 : index
      %90 = vector.load %arg5[%c0_49, %c0_50, %c0_51, %c0_52] : memref<1x4x8x128xf32, #tpu.memory_space<vmem>>, vector<1x4x8x128xf32>
      %91 = vector.shape_cast %90 : vector<1x4x8x128xf32> to vector<4x8x128xf32>
      %92 = vector.shape_cast %89 : vector<4x8x128xf32> to vector<1x4x8x128xf32>
      tpu.vector_store %arg5[%c0_49, %c0_50, %c0_51, %c0_52], %92 {strides = array<i32>} : memref<1x4x8x128xf32, #tpu.memory_space<vmem>>, vector<1x4x8x128xf32>,
      %cst_53 = arith.constant 0.000000e+00 : f32
      %93 = vector.broadcast %cst_53 : f32 to vector<4x8x128xf32>
      %c0_54 = arith.constant 0 : index
      %c0_55 = arith.constant 0 : index
      %c0_56 = arith.constant 0 : index
      %c0_57 = arith.constant 0 : index
      %94 = vector.load %arg6[%c0_54, %c0_55, %c0_56, %c0_57] : memref<1x4x8x128xf32, #tpu.memory_space<vmem>>, vector<1x4x8x128xf32>
      %95 = vector.shape_cast %94 : vector<1x4x8x128xf32> to vector<4x8x128xf32>
      %96 = vector.shape_cast %93 : vector<4x8x128xf32> to vector<1x4x8x128xf32>
      tpu.vector_store %arg6[%c0_54, %c0_55, %c0_56, %c0_57], %96 {strides = array<i32>} : memref<1x4x8x128xf32, #tpu.memory_space<vmem>>, vector<1x4x8x128xf32>,
      %cst_58 = arith.constant 0.000000e+00 : f32
      %97 = vector.broadcast %cst_58 : f32 to vector<4x8x128xf32>
      %c0_59 = arith.constant 0 : index
      %c0_60 = arith.constant 0 : index
      %c0_61 = arith.constant 0 : index
      %c0_62 = arith.constant 0 : index
      %98 = vector.load %arg7[%c0_59, %c0_60, %c0_61, %c0_62] : memref<1x4x8x128xf32, #tpu.memory_space<vmem>>, vector<1x4x8x128xf32>
      %99 = vector.shape_cast %98 : vector<1x4x8x128xf32> to vector<4x8x128xf32>
      %100 = vector.shape_cast %97 : vector<4x8x128xf32> to vector<1x4x8x128xf32>
      tpu.vector_store %arg7[%c0_59, %c0_60, %c0_61, %c0_62], %100 {strides = array<i32>} : memref<1x4x8x128xf32, #tpu.memory_space<vmem>>, vector<1x4x8x128xf32>,
      %cst_63 = arith.constant 0.000000e+00 : f32
      %101 = vector.broadcast %cst_63 : f32 to vector<8x128xf32>
      %c0_64 = arith.constant 0 : index
      %c0_65 = arith.constant 0 : index
      %c0_66 = arith.constant 0 : index
      %102 = vector.load %arg8[%c0_64, %c0_65, %c0_66] : memref<1x8x128xf32, #tpu.memory_space<vmem>>, vector<1x8x128xf32>
      %103 = vector.shape_cast %102 : vector<1x8x128xf32> to vector<8x128xf32>
      %104 = vector.shape_cast %101 : vector<8x128xf32> to vector<1x8x128xf32>
      tpu.vector_store %arg8[%c0_64, %c0_65, %c0_66], %104 {strides = array<i32>} : memref<1x8x128xf32, #tpu.memory_space<vmem>>, vector<1x8x128xf32>,
    } else {
    }
    %c0 = arith.constant 0 : index
    %c0_2 = arith.constant 0 : index
    %c0_3 = arith.constant 0 : index
    %c0_4 = arith.constant 0 : index
    %5 = vector.load %arg3[%c0, %c0_2, %c0_3, %c0_4] : memref<1x4x32x128xf32, #tpu.memory_space<vmem>>, vector<1x4x32x128xf32>
    %6 = vector.shape_cast %5 : vector<1x4x32x128xf32> to vector<4x32x128xf32>
    %c0_5 = arith.constant 0 : index
    %c0_6 = arith.constant 0 : index
    %c0_7 = arith.constant 0 : index
    %7 = vector.load %arg4[%c0_5, %c0_6, %c0_7] : memref<1x32x128xi8, #tpu.memory_space<vmem>>, vector<1x32x128xi8>
    %8 = vector.shape_cast %7 : vector<1x32x128xi8> to vector<32x128xi8>
    %9 = arith.extsi %8 : vector<32x128xi8> to vector<32x128xi32>
    %c1_i32 = arith.constant 1 : i32
    %10 = arith.muli %arg0, %c1_i32 : i32
    %11 = arith.addi %10, %arg2 : i32
    %c32_i32 = arith.constant 32 : i32
    %12 = arith.muli %11, %c32_i32 : i32
    %13 = tpu.iota {dimensions = array<i32: 0>} : vector<32x128xi32>
    %14 = vector.broadcast %12 : i32 to vector<32x128xi32>
    %15 = arith.addi %14, %13 : vector<32x128xi32>
    %c2_i32 = arith.constant 2 : i32
    %16 = vector.broadcast %c2_i32 : i32 to vector<32x128xi32>
    %17 = arith.cmpi slt, %15, %16 : vector<32x128xi32>
    %c0_i32_8 = arith.constant 0 : i32
    %18 = vector.broadcast %c0_i32_8 : i32 to vector<32x128xi32>
    %19 = arith.cmpi sge, %9, %18 : vector<32x128xi32>
    %20 = arith.andi %17, %19 : vector<32x128xi1>
    %21 = vector.shape_cast %20 : vector<32x128xi1> to vector<1x32x128xi1>
    %cst = arith.constant 0.000000e+00 : f32
    %22 = vector.shape_cast %21 : vector<1x32x128xi1> to vector<1x32x128xi1>
    %23 = vector.broadcast %22 : vector<1x32x128xi1> to vector<4x32x128xi1>
    %24 = vector.broadcast %cst : f32 to vector<4x32x128xf32>
    %25 = arith.select %23, %6, %24 : vector<4x32x128xi1>, vector<4x32x128xf32>
    %c-1_i32 = arith.constant -1 : i32
    %26 = vector.broadcast %c-1_i32 : i32 to vector<32x128xi32>
    %27 = arith.select %20, %9, %26 : vector<32x128xi1>, vector<32x128xi32>
    %cst_9 = arith.constant dense<0xFF800000> : vector<32x128xf32>
    %28 = vector.multi_reduction <maximumf>, %25, %cst_9 [0] : vector<4x32x128xf32> to vector<32x128xf32>
    %29 = vector.shape_cast %28 : vector<32x128xf32> to vector<1x32x128xf32>
    %30 = vector.broadcast %29 : vector<1x32x128xf32> to vector<4x32x128xf32>
    %31 = arith.subf %25, %30 : vector<4x32x128xf32>
    %32 = math.exp %31 : vector<4x32x128xf32>
    %cst_10 = arith.constant dense<0.000000e+00> : vector<32x128xf32>
    %33 = vector.multi_reduction <add>, %32, %cst_10 [0] : vector<4x32x128xf32> to vector<32x128xf32>
    %34 = tpu.reciprocal %33 : vector<32x128xf32> -> vector<32x128xf32>
    %35 = vector.shape_cast %34 : vector<32x128xf32> to vector<1x32x128xf32>
    %36 = vector.broadcast %35 : vector<1x32x128xf32> to vector<4x32x128xf32>
    %37 = arith.mulf %32, %36 : vector<4x32x128xf32>
    %38 = tpu.iota {dimensions = array<i32: 0>} : vector<4x32x128xi32>
    %39 = vector.shape_cast %27 : vector<32x128xi32> to vector<1x32x128xi32>
    %40 = vector.broadcast %39 : vector<1x32x128xi32> to vector<4x32x128xi32>
    %41 = arith.cmpi eq, %38, %40 : vector<4x32x128xi32>
    %42 = arith.extui %41 : vector<4x32x128xi1> to vector<4x32x128xi32>
    %43 = arith.sitofp %42 : vector<4x32x128xi32> to vector<4x32x128xf32>
    %44 = arith.mulf %37, %43 : vector<4x32x128xf32>
    %45 = vector.shape_cast %20 : vector<32x128xi1> to vector<1x32x128xi1>
    %cst_11 = arith.constant 0.000000e+00 : f32
    %46 = vector.shape_cast %45 : vector<1x32x128xi1> to vector<1x32x128xi1>
    %47 = vector.broadcast %46 : vector<1x32x128xi1> to vector<4x32x128xi1>
    %48 = vector.broadcast %cst_11 : f32 to vector<4x32x128xf32>
    %49 = arith.select %47, %37, %48 : vector<4x32x128xi1>, vector<4x32x128xf32>
    %50 = math.log %33 : vector<32x128xf32>
    %51 = arith.addf %50, %28 : vector<32x128xf32>
    %52 = arith.mulf %25, %43 : vector<4x32x128xf32>
    %cst_12 = arith.constant dense<0.000000e+00> : vector<32x128xf32>
    %53 = vector.multi_reduction <add>, %52, %cst_12 [0] : vector<4x32x128xf32> to vector<32x128xf32>
    %54 = arith.subf %51, %53 : vector<32x128xf32>
    %cst_13 = arith.constant 0.000000e+00 : f32
    %55 = vector.broadcast %cst_13 : f32 to vector<32x128xf32>
    %56 = arith.select %20, %54, %55 : vector<32x128xi1>, vector<32x128xf32>
    %c0_14 = arith.constant 0 : index
    %c0_15 = arith.constant 0 : index
    %c0_16 = arith.constant 0 : index
    %c0_17 = arith.constant 0 : index
    %57 = vector.load %arg5[%c0_14, %c0_15, %c0_16, %c0_17] : memref<1x4x8x128xf32, #tpu.memory_space<vmem>>, vector<1x4x8x128xf32>
    %58 = vector.shape_cast %57 : vector<1x4x8x128xf32> to vector<4x8x128xf32>
    %59 = vector.shape_cast %44 : vector<4x32x128xf32> to vector<4x4x8x128xf32>
    %cst_18 = arith.constant dense<0.000000e+00> : vector<4x8x128xf32>
    %60 = vector.multi_reduction <add>, %59, %cst_18 [1] : vector<4x4x8x128xf32> to vector<4x8x128xf32>
    %61 = arith.addf %58, %60 : vector<4x8x128xf32>
    %c0_19 = arith.constant 0 : index
    %c0_20 = arith.constant 0 : index
    %c0_21 = arith.constant 0 : index
    %c0_22 = arith.constant 0 : index
    %62 = vector.load %arg5[%c0_19, %c0_20, %c0_21, %c0_22] : memref<1x4x8x128xf32, #tpu.memory_space<vmem>>, vector<1x4x8x128xf32>
    %63 = vector.shape_cast %62 : vector<1x4x8x128xf32> to vector<4x8x128xf32>
    %64 = vector.shape_cast %61 : vector<4x8x128xf32> to vector<1x4x8x128xf32>
    tpu.vector_store %arg5[%c0_19, %c0_20, %c0_21, %c0_22], %64 {strides = array<i32>} : memref<1x4x8x128xf32, #tpu.memory_space<vmem>>, vector<1x4x8x128xf32>,
    %c0_23 = arith.constant 0 : index
    %c0_24 = arith.constant 0 : index
    %c0_25 = arith.constant 0 : index
    %c0_26 = arith.constant 0 : index
    %65 = vector.load %arg6[%c0_23, %c0_24, %c0_25, %c0_26] : memref<1x4x8x128xf32, #tpu.memory_space<vmem>>, vector<1x4x8x128xf32>
    %66 = vector.shape_cast %65 : vector<1x4x8x128xf32> to vector<4x8x128xf32>
    %67 = vector.shape_cast %49 : vector<4x32x128xf32> to vector<4x4x8x128xf32>
    %cst_27 = arith.constant dense<0.000000e+00> : vector<4x8x128xf32>
    %68 = vector.multi_reduction <add>, %67, %cst_27 [1] : vector<4x4x8x128xf32> to vector<4x8x128xf32>
    %69 = arith.addf %66, %68 : vector<4x8x128xf32>
    %c0_28 = arith.constant 0 : index
    %c0_29 = arith.constant 0 : index
    %c0_30 = arith.constant 0 : index
    %c0_31 = arith.constant 0 : index
    %70 = vector.load %arg6[%c0_28, %c0_29, %c0_30, %c0_31] : memref<1x4x8x128xf32, #tpu.memory_space<vmem>>, vector<1x4x8x128xf32>
    %71 = vector.shape_cast %70 : vector<1x4x8x128xf32> to vector<4x8x128xf32>
    %72 = vector.shape_cast %69 : vector<4x8x128xf32> to vector<1x4x8x128xf32>
    tpu.vector_store %arg6[%c0_28, %c0_29, %c0_30, %c0_31], %72 {strides = array<i32>} : memref<1x4x8x128xf32, #tpu.memory_space<vmem>>, vector<1x4x8x128xf32>,
    %c0_32 = arith.constant 0 : index
    %c0_33 = arith.constant 0 : index
    %c0_34 = arith.constant 0 : index
    %c0_35 = arith.constant 0 : index
    %73 = vector.load %arg7[%c0_32, %c0_33, %c0_34, %c0_35] : memref<1x4x8x128xf32, #tpu.memory_space<vmem>>, vector<1x4x8x128xf32>
    %74 = vector.shape_cast %73 : vector<1x4x8x128xf32> to vector<4x8x128xf32>
    %75 = vector.shape_cast %43 : vector<4x32x128xf32> to vector<4x4x8x128xf32>
    %cst_36 = arith.constant dense<0.000000e+00> : vector<4x8x128xf32>
    %76 = vector.multi_reduction <add>, %75, %cst_36 [1] : vector<4x4x8x128xf32> to vector<4x8x128xf32>
    %77 = arith.addf %74, %76 : vector<4x8x128xf32>
    %c0_37 = arith.constant 0 : index
    %c0_38 = arith.constant 0 : index
    %c0_39 = arith.constant 0 : index
    %c0_40 = arith.constant 0 : index
    %78 = vector.load %arg7[%c0_37, %c0_38, %c0_39, %c0_40] : memref<1x4x8x128xf32, #tpu.memory_space<vmem>>, vector<1x4x8x128xf32>
    %79 = vector.shape_cast %78 : vector<1x4x8x128xf32> to vector<4x8x128xf32>
    %80 = vector.shape_cast %77 : vector<4x8x128xf32> to vector<1x4x8x128xf32>
    tpu.vector_store %arg7[%c0_37, %c0_38, %c0_39, %c0_40], %80 {strides = array<i32>} : memref<1x4x8x128xf32, #tpu.memory_space<vmem>>, vector<1x4x8x128xf32>,
    %c0_41 = arith.constant 0 : index
    %c0_42 = arith.constant 0 : index
    %c0_43 = arith.constant 0 : index
    %81 = vector.load %arg8[%c0_41, %c0_42, %c0_43] : memref<1x8x128xf32, #tpu.memory_space<vmem>>, vector<1x8x128xf32>
    %82 = vector.shape_cast %81 : vector<1x8x128xf32> to vector<8x128xf32>
    %83 = vector.shape_cast %56 : vector<32x128xf32> to vector<4x8x128xf32>
    %cst_44 = arith.constant dense<0.000000e+00> : vector<8x128xf32>
    %84 = vector.multi_reduction <add>, %83, %cst_44 [0] : vector<4x8x128xf32> to vector<8x128xf32>
    %85 = arith.addf %82, %84 : vector<8x128xf32>
    %c0_45 = arith.constant 0 : index
    %c0_46 = arith.constant 0 : index
    %c0_47 = arith.constant 0 : index
    %86 = vector.load %arg8[%c0_45, %c0_46, %c0_47] : memref<1x8x128xf32, #tpu.memory_space<vmem>>, vector<1x8x128xf32>
    %87 = vector.shape_cast %86 : vector<1x8x128xf32> to vector<8x128xf32>
    %88 = vector.shape_cast %85 : vector<8x128xf32> to vector<1x8x128xf32>
    tpu.vector_store %arg8[%c0_45, %c0_46, %c0_47], %88 {strides = array<i32>} : memref<1x8x128xf32, #tpu.memory_space<vmem>>, vector<1x8x128xf32>,
    return
  }
  func.func @transform_0(%arg0: i32, %arg1: i32, %arg2: i32) -> (i32, i32, i32, i32) {
    %c1_i32 = arith.constant 1 : i32
    %0 = arith.muli %arg0, %c1_i32 : i32
    %1 = arith.addi %0, %arg2 : i32
    %c0_i32 = arith.constant 0 : i32
    %2 = arith.minsi %1, %c0_i32 : i32
    %c0_i32_0 = arith.constant 0 : i32
    %c0_i32_1 = arith.constant 0 : i32
    %c0_i32_2 = arith.constant 0 : i32
    return %arg1, %c0_i32_0, %2, %c0_i32_1 : i32, i32, i32, i32
  }
  func.func @transform_1(%arg0: i32, %arg1: i32, %arg2: i32) -> (i32, i32, i32) {
    %c1_i32 = arith.constant 1 : i32
    %0 = arith.muli %arg0, %c1_i32 : i32
    %1 = arith.addi %0, %arg2 : i32
    %c0_i32 = arith.constant 0 : i32
    %2 = arith.minsi %1, %c0_i32 : i32
    %c0_i32_0 = arith.constant 0 : i32
    %c0_i32_1 = arith.constant 0 : i32
    return %arg1, %2, %c0_i32_0 : i32, i32, i32
  }
  func.func @transform_2(%arg0: i32, %arg1: i32, %arg2: i32) -> (i32, i32, i32, i32) {
    %c0_i32 = arith.constant 0 : i32
    %c0_i32_0 = arith.constant 0 : i32
    %c0_i32_1 = arith.constant 0 : i32
    %c0_i32_2 = arith.constant 0 : i32
    return %arg0, %c0_i32, %c0_i32_0, %c0_i32_1 : i32, i32, i32, i32
  }
  func.func @transform_3(%arg0: i32, %arg1: i32, %arg2: i32) -> (i32, i32, i32, i32) {
    %c0_i32 = arith.constant 0 : i32
    %c0_i32_0 = arith.constant 0 : i32
    %c0_i32_1 = arith.constant 0 : i32
    %c0_i32_2 = arith.constant 0 : i32
    return %arg0, %c0_i32, %c0_i32_0, %c0_i32_1 : i32, i32, i32, i32
  }
  func.func @transform_4(%arg0: i32, %arg1: i32, %arg2: i32) -> (i32, i32, i32, i32) {
    %c0_i32 = arith.constant 0 : i32
    %c0_i32_0 = arith.constant 0 : i32
    %c0_i32_1 = arith.constant 0 : i32
    %c0_i32_2 = arith.constant 0 : i32
    return %arg0, %c0_i32, %c0_i32_0, %c0_i32_1 : i32, i32, i32, i32
  }
  func.func @transform_5(%arg0: i32, %arg1: i32, %arg2: i32) -> (i32, i32, i32) {
    %c0_i32 = arith.constant 0 : i32
    %c0_i32_0 = arith.constant 0 : i32
    %c0_i32_1 = arith.constant 0 : i32
    return %arg0, %c0_i32, %c0_i32_0 : i32, i32, i32
  }
}

</mosaic_0001>

<bundles_post_ra>
// kernel: tpu_custom_call.1
= control target key start
LH: loop header
LB: loop body
LE: loop exit
PB: predicated region body
PF: predicated region fallthrough
CT: control target
= control target key end

     0   :  { %11 = vsyncpa [#allocation3], 0  ;;  %s1579_s0 = inlined_call_operand.hbm [shape: f32[2,4,2,128], index: 0, kind: input, shape index: {}]   ;;  %s1580_s1 = inlined_call_operand.vmem [shape: s8[2,2,128], index: 1, kind: input, shape index: {}]   ;;  %s1581_s2 = inlined_call_operand.hbm [shape: f32[1,4,8,128], index: 2, kind: output, shape index: {0}]   ;;  %s1582_s3 = inlined_call_operand.hbm [shape: f32[1,4,8,128], index: 3, kind: output, shape index: {1}]   ;;  %s1583_s4 = inlined_call_operand.hbm [shape: f32[1,4,8,128], index: 4, kind: output, shape index: {2}]   ;;  %s1584_s5 = inlined_call_operand.hbm [shape: f32[1,8,128], index: 5, kind: output, shape index: {3}]  }
   0x1   :  { %13 = vsyncpa [#allocation3 + $0x1], 0 }
   0x2   :  { %14 = vsyncpa [#allocation4], 0 }
   0x3   :  { %15 = vsyncpa [#allocation7], 0 }
   0x4   :  { %16 = vsyncpa [#allocation10], 0  ;;  %s1311_s18 = smov 0   ;;  %s1313_s19 = smov 0  }
   0x5   :  { %s1315_s20 = smov 0   ;;  %s1317_s21 = smov 0  }
   0x6   :  { %s1319_s22 = smov 0   ;;  %s1321_s23 = smov 0  }
   0x7 LB: > { %s973_s24 = sadd.s32 4294967295, %s1265_s23   ;;  %s37_s25 = sadd.s32 1, %s1261_s22  ;;  %s1265_s23 = sphi %s1321_s23, %s22_s23   ;;  %s1261_s22 = sphi %s1319_s22, %s1593_s22   ;;  %s1257_s21 = sphi %s1317_s21, %s1592_s21   ;;  %s1253_s20 = sphi %s1315_s20, %s1591_s20   ;;  %s1249_s19 = sphi %s1313_s19, %s1590_s19   ;;  %s1245_s18 = sphi %s1311_s18, %s1589_s18  }
   0x8   : > { %p39_p0 = scmp.ge.s32.totalorder %s37_s25, 2  ;;  %s56_s26 = sadd.s32 1, %s1253_s20 }
   0x9   : > { %p63_p1 = scmp.ne.s32.totalorder %s1253_s20, %s1249_s19  ;;  %p64_p2 = scmp.eq.s32.totalorder %s1265_s23, 0 }
   0xa   : > { %s1595_s25 = smov (%p39_p0, %s37_s25), 0  ;;  %p69_p4 = scmp.ne.s32.totalorder %s1249_s19, %s1245_s18 }
   0xb   : > { %p65_p3 = por %p64_p2, %p63_p1  ;;  %s51_s27 = ssub.s32 %s1261_s22, %s1595_s25 }
   0xc   : > { %p70_p5 = scmp.eq.s32.totalorder %s973_s24, 0  ;;  %p54_p6 = scmp.eq.s32.totalorder %s51_s27, 0 }
   0xd   : > { %p975_p8 = scmp.ge.s32.totalorder %s1265_s23, 2 }
   0xe   : > { %p1352_p7 = por %p70_p5, %p69_p4 }
   0xf   : > { %s1357_s29 = scalar_select %p54_p6, %s1253_s20, %s56_s26  }
  0x10   : > { %227 = sbr.rel (%p975_p8) target bundleno = 43 (0x2b), region = 16 }
  0x17   : > { %230 = sbr.rel (!%p65_p3) target bundleno = 43 (0x2b), region = 20 }
  0x1e   : > { %s231_s30 = sand.u32 1, %s1253_s20  }
  0x1f   : > { %s976_s6 = sshll.u32 %s231_s30, 7  ;;  %s232_s7 = scalar_lea.sflag [#allocation3], %s231_s30 }
  0x20   : > { %s235_s8 = scalar_lea.vmem [#allocation2], %s976_s6 }
  0x21   : > { %244 = vsyncadd %s232_s7, 1920  ;;  %s998_s9 = sshll.u32 %s1261_s22, 7  ;;  %s256_s10 = sld [smem:[#allocation0]]  }
  0x22   : > { %s249_s13 = scalar_lea.hbm %s1579_s0, %s998_s9  ;;  %s264_s14 = sshll.u32 %s235_s8, 4  ;;  %s265_s14 = int_to_ptr.vmem [resolvable:$true] %s264_s14 }
  0x23   : > { %s1267_s15 = smov 32   ;;  %s1268_s16 = smov 512  }
  0x24   : > { %271 = sst [smem:[#allocation12]] %s1267_s15  ;;  %s1269_s17 = smov 1  }
  0x25   : > { %273 = sst [smem:[#allocation12 + $0x1]] %s1268_s16  ;;  %s1270_s27 = smov 2  }
  0x26   : > { %275 = sst [smem:[#allocation12 + $0x2]] %s1269_s17  ;;  %s1271_s30 = smov [#allocation11]  }
  0x27   : > { %s979_s18 = sshll.u32 %s256_s10, 26  ;;  %277 = sst [smem:[#allocation12 + $0x3]] %s1267_s15 }
  0x28   : > { %s980_s26 = sadd.s32 134217728, %s979_s18  ;;  %279 = sst [smem:[#allocation12 + $0x4]] %s1267_s15 }
  0x29   : > { %281 = sst [smem:[#allocation12 + $0x5]] %s1270_s27 }
  0x2a   : > { %283 = dma.general %s249_s13, 128, %s265_s14, %s232_s7, %s1271_s30, [#allocation12], %s980_s26, 0  }
  0x2b PF: > { %p981_p9 = scmp.ge.s32.totalorder %s1265_s23, 1  ;;  %p306_p10 = scmp.lt.s32.totalorder %s1265_s23, 3 }
  0x2d   : > { %p307_p11 = pnand %p981_p9, %p306_p10 }
  0x2e   : > { %s312_s6 = sand.u32 (!%p307_p11), 1, %s1249_s19  }
  0x2f   : > { %310 = sbr.rel (%p307_p11) target bundleno = 204 (0xcc), region = 28  ;;  %s982_s8 = sshll.u32 (!%p307_p11), %s312_s6, 7 }
  0x30   : > { %s313_s9 = scalar_lea.sflag (!%p307_p11), [#allocation3], %s312_s6  ;;  %s1368_s10 = scalar_lea.vmem (!%p307_p11), [#allocation2], %s982_s8 }
  0x36   : > { %1228 = dma.done.wait (%p1352_p7), %s313_s9, 2048  }
  0x37   : > { %1230 = vsyncadd (%p1352_p7), %s313_s9, 4294965248  ;;  %p362_p12 = scmp.lt.s32.totalorder %s1257_s21, 1  ;;  %p374_p13 = scmp.eq.s32.totalorder %s1257_s21, 0 }
  0x38   : > { %v1272_v0 = vmov (%p374_p13), 0.0  }
  0x39   : > { %s1597_s21 = smov (!%p362_p12, %s1257_s21), 1  ;;  %379 = sbr.rel (!%p374_p13) target bundleno = 65 (0x41), region = 36 }
  0x3a   : > { %s367_s12 = scalar_lea.vmem %s1580_s1, %s1597_s21  ;;  %380 = vst [vmem:[#allocation5] sm:$0xff] (%p374_p13), %v1272_v0  ;;  %381 = vst [vmem:[#allocation5 + $0x8] sm:$0xff] (%p374_p13), %v1272_v0 }
  0x3b   : > { %382 = vst [vmem:[#allocation5 + $0x10] sm:$0xff] (%p374_p13), %v1272_v0  ;;  %383 = vst [vmem:[#allocation5 + $0x18] sm:$0xff] (%p374_p13), %v1272_v0 }
  0x3c   : > { %384 = vst [vmem:[#allocation6] sm:$0xff] (%p374_p13), %v1272_v0  ;;  %385 = vst [vmem:[#allocation6 + $0x8] sm:$0xff] (%p374_p13), %v1272_v0 }
  0x3d   : > { %386 = vst [vmem:[#allocation6 + $0x10] sm:$0xff] (%p374_p13), %v1272_v0  ;;  %387 = vst [vmem:[#allocation6 + $0x18] sm:$0xff] (%p374_p13), %v1272_v0 }
  0x3e   : > { %388 = vst [vmem:[#allocation8] sm:$0xff] (%p374_p13), %v1272_v0  ;;  %389 = vst [vmem:[#allocation8 + $0x8] sm:$0xff] (%p374_p13), %v1272_v0 }
  0x3f   : > { %390 = vst [vmem:[#allocation8 + $0x10] sm:$0xff] (%p374_p13), %v1272_v0  ;;  %391 = vst [vmem:[#allocation8 + $0x18] sm:$0xff] (%p374_p13), %v1272_v0 }
  0x40   : > { %392 = vst [vmem:[#allocation9] sm:$0xff] %v1272_v0 }
  0x41 PF: > { %v427_v1 = vlaneseq  ;;  %v409_v2 = vld [vmem:[%s367_s12] sm:$0x1]  ;;  %v410_v3 = vld [vmem:[%s367_s12 + $0x1] sm:$0x1]  ;;  %v1273_v7 = vmov 0   ;;  %v1274_v28 = vmov 0.0  }
  0x42   : > { %v417_v4 = vunpack.c.0.s8 %v409_v2  ;;  %v418_v5 = vunpack.c.0.s8 %v410_v3  ;;  %v393_v11 = vld [vmem:[%s1368_s10] sm:$0xff]  ;;  %p1422_p0 = scmp.eq.s32.totalorder %s973_s24, 1  ;;  %s1275_s28 = smov [#allocation6]  }
  0x43   : > { %v428_v6 = vshrl.u32 %v427_v1, 7  ;;  %v397_v12 = vld [vmem:[%s1368_s10 + $0x20] sm:$0xff]  ;;  %s824_s13 = sshll.u32 %s1275_s28, 4  ;;  %s1276_s14 = smov [#allocation8]   ;;  %s1436_s13 = int_to_ptr.vmem [resolvable:$true] %s824_s13 }
  0x44   : > { %vm441_vm0 = vcmp.ge.s32.totalorder %v417_v4, 0  ;;  %vm442_vm1 = vcmp.ge.s32.totalorder %v418_v5, 0  ;;  %v401_v13 = vld [vmem:[%s1368_s10 + $0x40] sm:$0xff]  ;;  %v493_v14 = vcombine.low %v417_v4, %v418_v5  ;;  %v746_v0 = vld [vmem:[#allocation6 + $0x8] sm:$0xff]  ;;  %s840_s15 = sshll.u32 %s1276_s14, 4  ;;  %s1277_s24 = smov [#allocation5]   ;;  %s1442_s15 = int_to_ptr.vmem [resolvable:$true] %s840_s15 }
  0x45   : > { %v449_v8 = vsel %vm441_vm0, 1, %v1273_v7  ;;  %v450_v9 = vsel %vm442_vm1, 1, %v1273_v7  ;;  %vm437_vm2 = vcmp.lt.s32.totalorder %v428_v6, 2  ;;  %v405_v15 = vld [vmem:[%s1368_s10 + $0x60] sm:$0xff]  ;;  %v747_v2 = vld [vmem:[#allocation6 + $0x10] sm:$0xff]  ;;  %v748_v4 = vld [vmem:[#allocation6 + $0x18] sm:$0xff]  ;;  %p1106_p4 = scmp.lt.s32.totalorder %s1436_s13, %s1436_s13 }
  0x46   : > { %v457_v10 = vcombine.low %v449_v8, %v450_v9  ;;  %v769_v23 = vld [vmem:[#allocation8] sm:$0xff]  ;;  %v770_v24 = vld [vmem:[#allocation8 + $0x8] sm:$0xff]  ;;  %s808_s16 = sshll.u32 %s1277_s24, 4  ;;  %s1278_s17 = smov [#allocation9]   ;;  %s1445_s16 = int_to_ptr.vmem [resolvable:$true] %s808_s16 }
  0x47   : > { %v771_v26 = vld [vmem:[#allocation8 + $0x10] sm:$0xff]  ;;  %v772_v27 = vld [vmem:[#allocation8 + $0x18] sm:$0xff]  ;;  %v745_v60 = vld [vmem:[#allocation6] sm:$0xff]  ;;  %s1447_s18 = sshll.u32 %s1278_s17, 4  ;;  %s1099_s26 = scalar_lea.vmem %s1436_s13, 512  ;;  %s857_s18 = int_to_ptr.vmem [resolvable:$true] %s1447_s18 }
  0x48   : > { %vm461_vm3 = vcmp.ne.s32.totalorder %v457_v10, 0  ;;  %v721_v5 = vld [vmem:[#allocation5] sm:$0xff]  ;;  %p1100_p1 = scmp.ne.s32.totalorder %s1436_s13, %s1099_s26  ;;  %p1107_p5 = scmp.lt.s32.totalorder %s1099_s26, %s1099_s26 }
  0x49   : > { %vm1384_vm4 = vmand %vm437_vm2, %vm461_vm3 }
  0x4a   : > { %v477_v17 = vsel %vm1384_vm4, %v393_v11, 0.0  ;;  %v481_v18 = vsel %vm1384_vm4, %v397_v12, 0.0  ;;  %v485_v19 = vsel %vm1384_vm4, %v401_v13, 0.0  ;;  %v489_v20 = vsel %vm1384_vm4, %v405_v15, 0.0  ;;  %p1101_p2 = pnand %p1100_p1, %p1422_p0  ;;  %p1108_p6 = por %p1107_p5, %p1106_p4 }
  0x4b   : > { %v501_v21 = vmax.f32 %v477_v17, %v481_v18  ;;  %v497_v22 = vsel %vm1384_vm4, %v493_v14, 4294967295 }
  0x4c   : > { %vm593_vm5 = vcmp.eq.s32.totalorder %v497_v22, 0  ;;  %vm597_vm6 = vcmp.eq.s32.totalorder %v497_v22, 1  ;;  %vm601_vm7 = vcmp.eq.s32.totalorder %v497_v22, 2  ;;  %vm605_vm8 = vcmp.eq.s32.totalorder %v497_v22, 3  ;;  %p1102_p3 = pneg %p1101_p2 }
  0x4d   : > { %v502_v25 = vmax.f32 %v501_v21, %v485_v19  ;;  %v1398_v29 = vsel %vm593_vm5, 1.0, %v1274_v28  ;;  %v1400_v30 = vsel %vm597_vm6, 1.0, %v1274_v28  ;;  %v1402_v31 = vsel %vm601_vm7, 1.0, %v1274_v28 }
  0x4e   : > { %v1406_v33 = vsel %vm605_vm8, 1.0, %v1274_v28  ;;  %v785_v34 = vadd.f32 %v1398_v29, %v769_v23  ;;  %v786_v35 = vadd.f32 %v1400_v30, %v770_v24  ;;  %v787_v36 = vadd.f32 %v1402_v31, %v771_v26  ;;  %p1109_p7 = pnand %p1108_p6, %p1102_p3 }
  0x4f   : > { %v1404_v32 = vmax.f32 %v502_v25, %v489_v20  ;;  %v788_v37 = vadd.f32 %v1406_v33, %v772_v27  ;;  %v685_v53 = vmul.f32 %v1398_v29, %v477_v17  ;;  %v689_v54 = vmul.f32 %v1400_v30, %v481_v18 }
  0x50   : > { %789 = vst [vmem:[#allocation8] sm:$0xff] %v785_v34  ;;  %790 = vst [vmem:[#allocation8 + $0x8] sm:$0xff] %v786_v35  ;;  %v693_v56 = vmul.f32 %v1402_v31, %v485_v19  ;;  %v697_v57 = vmul.f32 %v1406_v33, %v489_v20 }
  0x51   : > { %v513_v38 = vsub.f32 %v477_v17, %v1404_v32  ;;  %v517_v39 = vsub.f32 %v481_v18, %v1404_v32  ;;  %v521_v40 = vsub.f32 %v485_v19, %v1404_v32  ;;  %v525_v41 = vsub.f32 %v489_v20, %v1404_v32  ;;  %791 = vst [vmem:[#allocation8 + $0x10] sm:$0xff] %v787_v36  ;;  %v722_v17 = vld [vmem:[#allocation5 + $0x8] sm:$0xff]  ;;  %v723_v18 = vld [vmem:[#allocation5 + $0x10] sm:$0xff]  ;;  %v724_v19 = vld [vmem:[#allocation5 + $0x18] sm:$0xff] }
  0x52   : > { %792 = vst [vmem:[#allocation8 + $0x18] sm:$0xff] %v788_v37  ;;  %v701_v55 = vadd.f32 %v689_v54, %v685_v53 }
  0x53   : > { %v529_v42 = vmul.f32 1.442695, %v513_v38  ;;  %v537_v43 = vmul.f32 1.442695, %v517_v39  ;;  %v545_v44 = vmul.f32 1.442695, %v521_v40 }
  0x54   : > { %v553_v45 = vmul.f32 1.442695, %v525_v41  ;;  %v702_v58 = vadd.f32 %v701_v55, %v693_v56 }
  0x55   : > { %1087 = vpow2.f32 %v529_v42 }
  0x56   : > { %1089 = vpow2.f32 %v537_v43  ;;  %v1426_v7 = vadd.f32 %v702_v58, %v697_v57 }
  0x57   : > { %1091 = vpow2.f32 %v545_v44 }
  0x58   : > { %1093 = vpow2.f32 %v553_v45 }
  0x5f   : > { %v1088_v46 = vpop.eup %1087 }
  0x60   : > { %v1090_v47 = vpop.eup %1089 }
  0x61   : > { %v1092_v48 = vpop.eup %1091  ;;  %v561_v49 = vadd.f32 %v1090_v47, %v1088_v46 }
  0x62   : > { %v1094_v50 = vpop.eup %1093 }
  0x63   : > { %v562_v51 = vadd.f32 %v1092_v48, %v561_v49 }
  0x65   : > { %v563_v52 = vadd.f32 %v1094_v50, %v562_v51 }
  0x67   : > { %1095 = vrcp.f32 %v563_v52 }
  0x68   : > { %1097 = vlog2.f32 %v563_v52 }
  0x71   : > { %v1096_v59 = vpop.eup %1095 }
  0x72   : > { %v1098_v61 = vpop.eup %1097  ;;  %v577_v62 = vmul.f32 %v1096_v59, %v1088_v46  ;;  %v581_v63 = vmul.f32 %v1096_v59, %v1090_v47  ;;  %v585_v1 = vmul.f32 %v1096_v59, %v1092_v48  ;;  %v589_v3 = vmul.f32 %v1096_v59, %v1094_v50 }
  0x73   : > { %v674_v6 = vmul.f32 0.6931472, %v1098_v61 }
  0x74   : > { %v657_v8 = vsel %vm1384_vm4, %v577_v62, 0.0  ;;  %v661_v9 = vsel %vm1384_vm4, %v581_v63, 0.0  ;;  %v665_v10 = vsel %vm1384_vm4, %v585_v1, 0.0  ;;  %v669_v11 = vsel %vm1384_vm4, %v589_v3, 0.0 }
  0x75   : > { %v761_v12 = vadd.f32 %v745_v60, %v657_v8  ;;  %v762_v13 = vadd.f32 %v746_v0, %v661_v9  ;;  %v763_v14 = vadd.f32 %v747_v2, %v665_v10  ;;  %v764_v15 = vadd.f32 %v748_v4, %v669_v11 }
  0x76   : > { %v641_v20 = vmul.f32 %v1398_v29, %v577_v62  ;;  %v645_v21 = vmul.f32 %v1400_v30, %v581_v63  ;;  %v649_v22 = vmul.f32 %v1402_v31, %v585_v1  ;;  %v653_v23 = vmul.f32 %v1406_v33, %v589_v3 }
  0x77   : > { %765 = vst [vmem:[#allocation6] sm:$0xff] %v761_v12  ;;  %766 = vst [vmem:[#allocation6 + $0x8] sm:$0xff] %v762_v13  ;;  %v681_v24 = vadd.f32 %v674_v6, %v1404_v32 }
  0x78   : > { %767 = vst [vmem:[#allocation6 + $0x10] sm:$0xff] %v763_v14  ;;  %768 = vst [vmem:[#allocation6 + $0x18] sm:$0xff] %v764_v15  ;;  %v737_v25 = vadd.f32 %v721_v5, %v641_v20  ;;  %v738_v26 = vadd.f32 %v722_v17, %v645_v21  ;;  %v739_v27 = vadd.f32 %v723_v18, %v649_v22 }
  0x79   : > { %v740_v28 = vadd.f32 %v724_v19, %v653_v23 }
  0x7a   : > { %1112 = shalt.err (!%p1109_p7)
}
  0x7b   : > { %s1113_s6 = scalar_lea.hbm %s1582_s3, 512 }
  0x7c   : > { %p1114_p8 = scmp.ne.s32.totalorder %s1582_s3, %s1113_s6  ;;  %p1119_p11 = scmp.lt.u32.totalorder %s1113_s6, %s1582_s3 }
  0x7e   : > { %p1115_p9 = pnand %p1114_p8, %p1422_p0 }
  0x80   : > { %p1116_p10 = pneg %p1115_p9 }
  0x82   : > { %p1121_p12 = pnand %p1119_p11, %p1116_p10 }
  0x84   : > { %1124 = shalt.err (!%p1121_p12)
}
  0x85   : > { %s1279_s11 = smov 128   ;;  %s1280_s12 = smov 8   ;;  %v713_v29 = vsub.f32 %v681_v24, %v1426_v7  ;;  %v793_v30 = vld [vmem:[#allocation9] sm:$0xff] }
  0x86   : > { %1004 = dma.vmem_to_hbm [thread:$0]  (%p1422_p0), %s1436_s13, 512, %s1582_s3, [#allocation7], %s1279_s11, %s1279_s11, %s1280_s12  }
  0x87   : > { %s1125_s24 = scalar_lea.vmem %s1442_s15, 512  ;;  %p1132_p3 = scmp.lt.s32.totalorder %s1442_s15, %s1442_s15 }
  0x88   : > { %p1126_p13 = scmp.ne.s32.totalorder %s1442_s15, %s1125_s24  ;;  %p1133_p4 = scmp.lt.s32.totalorder %s1125_s24, %s1125_s24 }
  0x8a   : > { %p1127_p1 = pnand %p1126_p13, %p1422_p0  ;;  %p1134_p5 = por %p1133_p4, %p1132_p3 }
  0x8c   : > { %p1128_p2 = pneg %p1127_p1 }
  0x8e   : > { %p1135_p6 = pnand %p1134_p5, %p1128_p2 }
  0x90   : > { %1138 = shalt.err (!%p1135_p6)
}
  0x91   : > { %s1139_s27 = scalar_lea.hbm %s1583_s4, 512 }
  0x92   : > { %p1140_p7 = scmp.ne.s32.totalorder %s1583_s4, %s1139_s27  ;;  %p1145_p10 = scmp.lt.u32.totalorder %s1139_s27, %s1583_s4 }
  0x94   : > { %p1141_p8 = pnand %p1140_p7, %p1422_p0 }
  0x96   : > { %p1142_p9 = pneg %p1141_p8 }
  0x98   : > { %p1147_p11 = pnand %p1145_p10, %p1142_p9 }
  0x9a   : > { %1150 = shalt.err (!%p1147_p11)
}
  0x9b   : > { %1006 = dma.vmem_to_hbm [thread:$0]  (%p1422_p0), %s1442_s15, 512, %s1583_s4, [#allocation7], %s1279_s11, %s1279_s11, %s1280_s12   ;;  %741 = vst [vmem:[#allocation5] sm:$0xff] %v737_v25  ;;  %742 = vst [vmem:[#allocation5 + $0x8] sm:$0xff] %v738_v26  ;;  %v717_v31 = vsel %vm1384_vm4, %v713_v29, 0.0 }
  0x9c   : > { %743 = vst [vmem:[#allocation5 + $0x10] sm:$0xff] %v739_v27  ;;  %744 = vst [vmem:[#allocation5 + $0x18] sm:$0xff] %v740_v28  ;;  %s1151_s7 = scalar_lea.vmem %s1445_s16, 512  ;;  %p1158_p2 = scmp.lt.s32.totalorder %s1445_s16, %s1445_s16 }
  0x9d   : > { %p1152_p12 = scmp.ne.s32.totalorder %s1445_s16, %s1151_s7  ;;  %p1159_p3 = scmp.lt.s32.totalorder %s1151_s7, %s1151_s7 }
  0x9f   : > { %p1153_p13 = pnand %p1152_p12, %p1422_p0  ;;  %p1160_p4 = por %p1159_p3, %p1158_p2 }
  0xa1   : > { %p1154_p1 = pneg %p1153_p13 }
  0xa3   : > { %p1161_p5 = pnand %p1160_p4, %p1154_p1 }
  0xa5   : > { %1164 = shalt.err (!%p1161_p5)
}
  0xa6   : > { %s1165_s14 = scalar_lea.hbm %s1581_s2, 512 }
  0xa7   : > { %p1166_p6 = scmp.ne.s32.totalorder %s1581_s2, %s1165_s14  ;;  %p1171_p9 = scmp.lt.u32.totalorder %s1165_s14, %s1581_s2 }
  0xa9   : > { %p1167_p7 = pnand %p1166_p6, %p1422_p0 }
  0xab   : > { %p1168_p8 = pneg %p1167_p7 }
  0xad   : > { %p1173_p10 = pnand %p1171_p9, %p1168_p8 }
  0xaf   : > { %1176 = shalt.err (!%p1173_p10)
}
  0xb0   : > { %1002 = dma.vmem_to_hbm [thread:$0]  (%p1422_p0), %s1445_s16, 512, %s1581_s2, [#allocation4], %s1279_s11, %s1279_s11, %s1280_s12   ;;  %v797_v16 = vadd.f32 %v793_v30, %v717_v31 }
  0xb1   : > { %s1177_s6 = scalar_lea.vmem %s857_s18, 128  ;;  %p1184_p1 = scmp.lt.s32.totalorder %s857_s18, %s857_s18 }
  0xb2   : > { %798 = vst [vmem:[#allocation9] sm:$0xff] %v797_v16  ;;  %p1178_p11 = scmp.ne.s32.totalorder %s857_s18, %s1177_s6  ;;  %p1185_p2 = scmp.lt.s32.totalorder %s1177_s6, %s1177_s6 }
  0xb4   : > { %p1179_p12 = pnand %p1178_p11, %p1422_p0  ;;  %p1186_p3 = por %p1185_p2, %p1184_p1 }
  0xb6   : > { %p1180_p13 = pneg %p1179_p12 }
  0xb8   : > { %p1187_p4 = pnand %p1186_p3, %p1180_p13 }
  0xba   : > { %1190 = shalt.err (!%p1187_p4)
}
  0xbb   : > { %s1191_s10 = scalar_lea.hbm %s1584_s5, 128 }
  0xbc   : > { %p1192_p5 = scmp.ne.s32.totalorder %s1584_s5, %s1191_s10  ;;  %p1197_p8 = scmp.lt.u32.totalorder %s1191_s10, %s1584_s5 }
  0xbe   : > { %p1193_p6 = pnand %p1192_p5, %p1422_p0 }
  0xc0   : > { %p1194_p7 = pneg %p1193_p6 }
  0xc2   : > { %p1199_p9 = pnand %p1197_p8, %p1194_p7 }
  0xc4   : > { %1202 = shalt.err (!%p1199_p9)
}
  0xc5   : > { %1008 = dma.vmem_to_hbm [thread:$0]  (%p1422_p0), %s857_s18, 128, %s1584_s5, [#allocation10]  }
  0xc6   : > { %1232 = dma.done.wait (%p1422_p0), [#allocation4], 512  }
  0xc7   : > { %1234 = vsyncadd (%p1422_p0), [#allocation4], 4294966784 }
  0xc8   : > { %1236 = dma.done.wait (%p1422_p0), [#allocation7], 1024  }
  0xc9   : > { %1238 = vsyncadd (%p1422_p0), [#allocation7], 4294966272 }
  0xca   : > { %1240 = dma.done.wait (%p1422_p0), [#allocation10], 128  }
  0xcb   : > { %1242 = vsyncadd (%p1422_p0), [#allocation10], 4294967168 }
  0xcc PF: > { %s22_s23 = sadd.s32 1, %s1265_s23   ;;  %s1589_s18 = smov %s1249_s19 }
  0xcd   : > { %p19_p10 = scmp.ge.s32.totalorder %s22_s23, 4   ;;  %s1590_s19 = smov %s1253_s20 }
  0xce   : > { %s1591_s20 = smov %s1357_s29  ;;  %s1592_s21 = smov %s1261_s22 }
  0xcf   : > { %s1593_s22 = smov %s1595_s25  ;;  %21 = sbr.rel (!%p19_p10) target bundleno = 7 (0x7), region = 105 }
  0xd6   :  { %881 = vsyncpa [#allocation3], 1 }
  0xd7   :  { %883 = vsyncpa [#allocation3 + $0x1], 1 }
  0xd8   :  { %884 = vsyncpa [#allocation4], 1 }
  0xd9   :  { %886 = vsyncpa [#allocation4 + $0x1], 1 }
  0xda   :  { %887 = vsyncpa [#allocation7], 1 }
  0xdb   :  { %888 = vsyncpa [#allocation10], 1 }

</bundles_post_ra>
